<compile_context>
chip_gen: v7x
topology: tpu7x:2x2x1
jax: 0.10.0
libtpu: 0.0.40
codegen_flags: <defaults>
</compile_context>

<pallas_src>
import functools

import jax
import jax.numpy as jnp
from jax.experimental import pallas as pl
from jax.experimental.pallas import tpu as pltpu


def _round_up(n, m):
    return ((n + m - 1) // m) * m


def _vmem_budget_bytes():
    """Physical VMEM per TensorCore minus headroom for Mosaic-internal scratch."""
    cap = 64 * 2**20                      # conservative fallback: v7x per-TC VMEM
    try:
        info = pltpu.get_tpu_info()
        cap = int(getattr(info, "vmem_capacity_bytes", cap))
    except Exception:
        pass
    return max(32 * 2**20, cap - 16 * 2**20)


def _bn_flow_direct_kernel(x_ref, p_ref, y_ref, s_ref,
                           *, eps: float, momentum: float, with_running: bool):
    """One feature block: batch-stat reduction + affine + logdet row (+ running blend).

    x_ref: (B, F) inputs           p_ref: (2 or 4, F) f32  [log_gamma; beta; (rmean; rvar)]
    y_ref: (B, F) outputs          s_ref: (3 or 5, F) f32  [mean; var; ld_contrib; (nrm; nrv)]
    """
    x = x_ref[...].astype(jnp.float32)                     # (B, F) f32 accumulation
    lg = p_ref[0:1, :]                                     # (1, F)
    beta = p_ref[1:2, :]                                   # (1, F)

    # Batch statistics (reduction over the batch / sublane axis), stable two-pass variance.
    inv_b = jnp.float32(1.0 / x.shape[0])
    mean = jnp.sum(x, axis=0, keepdims=True) * inv_b       # (1, F)
    centered = x - mean
    var = jnp.sum(centered * centered, axis=0, keepdims=True) * inv_b + eps

    # y = exp(lg) * (x - mean) / sqrt(var) + beta, factored into one per-element FMA
    # (x * scale + shift) so only one full-array temp is live at a time.
    scale = jnp.exp(lg) * jax.lax.rsqrt(var)               # (1, F)
    shift = beta - mean * scale                            # (1, F)
    y_ref[...] = (x * scale + shift).astype(y_ref.dtype)

    # Packed per-feature stats output (single lane-wide store).
    rows = [mean, var, lg - 0.5 * jnp.log(var)]            # logdet contribution per feature
    if with_running:                                       # static Python bool
        rows.append(p_ref[2:3, :] * momentum + mean * (1.0 - momentum))
        rows.append(p_ref[3:4, :] * momentum + var * (1.0 - momentum))
    s_ref[...] = jnp.concatenate(rows, axis=0)


def batch_norm_flow_direct(x, log_gamma, beta, *, eps=1e-5, momentum=0.0,
                           running_mean=None, running_var=None,
                           _force_feature_tiling=False):
    """Forward pass of BatchNormFlow (mode='direct', training=True).

    Returns (y, logdet, new_running_mean, new_running_var, batch_mean, batch_var):
      y: (B, D), logdet: (1,)  -- matching the PyTorch module's (y, sum(-1, keepdim=True)),
      plus functional replacements for the module's buffers / cached batch stats.
    """
    B, D = x.shape
    itemsize = jnp.dtype(x.dtype).itemsize
    with_running = float(momentum) != 0.0                  # momentum==0 -> blend is identity
    n_param_rows = 4 if with_running else 2
    n_stat_rows = 5 if with_running else 3

    # Pack ALL per-feature row operands into one f32 transfer each way.
    rows = [log_gamma, beta]
    if with_running:
        if running_mean is None:
            running_mean = jnp.zeros((D,), jnp.float32)
        if running_var is None:
            running_var = jnp.ones((D,), jnp.float32)
        rows += [running_mean, running_var]
    params = jnp.stack([jnp.asarray(r, jnp.float32).reshape(D) for r in rows], axis=0)

    kernel = functools.partial(_bn_flow_direct_kernel, eps=float(eps),
                               momentum=float(momentum), with_running=with_running)

    budget = _vmem_budget_bytes()
    # x in + y out buffers, full-array f32 temps (upcast / centered / x*scale), row tiles, slack.
    est_single = (2 * B * D * itemsize
                  + 3 * B * D * 4
                  + 2 * 8 * _round_up(D, 128) * 4
                  + (2 << 20))

    out_shapes = (jax.ShapeDtypeStruct((B, D), x.dtype),               # y
                  jax.ShapeDtypeStruct((n_stat_rows, D), jnp.float32))  # packed stats

    use_tiled = (_force_feature_tiling or est_single > budget) and (D % 128 == 0) and D >= 128

    if not use_tiled:
        # Single whole-array block: no grid bookkeeping, one DMA per (packed) operand.
        # TODO(synk): shapes with D % 128 != 0 that also overflow VMEM would need an
        # Element/BoundedSlice-style feature split; not needed for flow-sized inputs.
        vmem_limit = int(min(budget, max(32 * 2**20, est_single)))
        vmem = pl.BlockSpec(memory_space=pltpu.MemorySpace.VMEM)
        y, stats = pl.pallas_call(
            kernel,
            out_shape=out_shapes,
            in_specs=[vmem, vmem],
            out_specs=(vmem, vmem),
            compiler_params=pltpu.CompilerParams(vmem_limit_bytes=vmem_limit),
        )(x, params)
    else:
        # Feature-tiled grid: per-feature stats are independent, so each tile is a complete
        # BN-flow over its feature slice.  "parallel" lets megacore chips (v7x) shard tiles
        # across TensorCores and the BlockSpec pipeline overlaps DMA with compute.
        def block_bytes(tile):
            io = 2 * B * tile * itemsize + 2 * 8 * tile * 4   # x/y blocks + param/stat blocks
            return 2 * io + 3 * B * tile * 4                  # double-buffered I/O + f32 temps

        if _force_feature_tiling:
            tile_f = min(D, 128)                              # small tile: test hook
        else:
            tile_f = None
            for t in range(D, 0, -128):                       # largest divisor tile that fits
                if D % t == 0 and block_bytes(t) + (2 << 20) <= budget:
                    tile_f = t
                    break
            if tile_f is None:
                tile_f = 128  # TODO(synk): also tile the batch axis (two-pass stats) for huge B.
        nf = D // tile_f
        vmem_limit = int(min(budget, max(32 * 2**20, block_bytes(tile_f) + (2 << 20))))
        y, stats = pl.pallas_call(
            kernel,
            out_shape=out_shapes,
            grid_spec=pltpu.PrefetchScalarGridSpec(
                num_scalar_prefetch=0,
                grid=(nf,),
                in_specs=[pl.BlockSpec((B, tile_f), lambda f: (0, f)),
                          pl.BlockSpec((n_param_rows, tile_f), lambda f: (0, f))],
                out_specs=[pl.BlockSpec((B, tile_f), lambda f: (0, f)),
                           pl.BlockSpec((n_stat_rows, tile_f), lambda f: (0, f))]),
            compiler_params=pltpu.CompilerParams(
                dimension_semantics=("parallel",),
                vmem_limit_bytes=vmem_limit),
        )(x, params)

    batch_mean = stats[0]
    batch_var = stats[1]
    logdet = jnp.sum(stats[2]).reshape(1)        # tiny reduce, fuses with the row extraction
    if with_running:
        new_running_mean, new_running_var = stats[3], stats[4]
    else:
        new_running_mean, new_running_var = batch_mean, batch_var   # momentum == 0

    return y, logdet, new_running_mean, new_running_var, batch_mean, batch_var


def _reference_direct(x, log_gamma, beta, eps=1e-5):
    """Pure-JAX reference mirroring the PyTorch forward (direct, training)."""
    mean = jnp.mean(x, axis=0)
    var = jnp.mean((x - mean) ** 2, axis=0) + eps
    x_hat = (x - mean) / jnp.sqrt(var)
    y = jnp.exp(log_gamma) * x_hat + beta
    logdet = jnp.sum(log_gamma - 0.5 * jnp.log(var), axis=-1, keepdims=True)
    return y, logdet, mean, var


if __name__ == "__main__":
    key = jax.random.PRNGKey(0)
    kx, kg, kb = jax.random.split(key, 3)
    B, D = 16, 32                      # batch=16, num_inputs=32 (flow over flat features)
    x = jax.random.normal(kx, (B, D), dtype=jnp.float32)
    log_gamma = 0.1 * jax.random.normal(kg, (D,), dtype=jnp.float32)
    beta = 0.1 * jax.random.normal(kb, (D,), dtype=jnp.float32)

    y_ref, logdet_ref, mean_ref, var_ref = _reference_direct(x, log_gamma, beta, eps=1e-5)

    # --- default path: momentum = 0.0 (specialized), single whole-array block, no padding ---
    fwd = jax.jit(functools.partial(batch_norm_flow_direct, eps=1e-5, momentum=0.0))
    y, logdet, r_mean, r_var, b_mean, b_var = fwd(x, log_gamma, beta)
    y = jax.block_until_ready(y)
    logdet = jax.block_until_ready(logdet)

    assert y.shape == (B, D) and logdet.shape == (1,)
    assert jnp.allclose(y, y_ref, atol=1e-5, rtol=1e-5)
    assert jnp.allclose(logdet, logdet_ref, atol=1e-5, rtol=1e-5)
    assert jnp.allclose(b_mean, mean_ref, atol=1e-5, rtol=1e-5)
    assert jnp.allclose(b_var, var_ref, atol=1e-5, rtol=1e-5)
    # momentum = 0.0 -> running stats become the batch stats (as in the PyTorch module).
    assert jnp.allclose(r_mean, mean_ref, atol=1e-5, rtol=1e-5)
    assert jnp.allclose(r_var, var_ref, atol=1e-5, rtol=1e-5)

    # --- nonzero momentum: fused running-stat blend (packed extra param/stat rows) ---
    rm0 = jnp.full((D,), 0.25, jnp.float32)
    rv0 = jnp.full((D,), 2.0, jnp.float32)
    fwd_m = jax.jit(functools.partial(batch_norm_flow_direct, eps=1e-5, momentum=0.3))
    y2, logdet2, rm2, rv2, bm2, bv2 = fwd_m(x, log_gamma, beta,
                                            running_mean=rm0, running_var=rv0)
    jax.block_until_ready(y2)
    assert jnp.allclose(y2, y_ref, atol=1e-5, rtol=1e-5)
    assert jnp.allclose(logdet2, logdet_ref, atol=1e-5, rtol=1e-5)
    assert jnp.allclose(rm2, 0.3 * rm0 + 0.7 * mean_ref, atol=1e-5, rtol=1e-5)
    assert jnp.allclose(rv2, 0.3 * rv0 + 0.7 * var_ref, atol=1e-5, rtol=1e-5)

    # --- feature-tiled grid path (the structure large B*D / v7x would use), forced small ---
    kx2, kg2, kb2 = jax.random.split(jax.random.PRNGKey(1), 3)
    D2 = 256
    x2 = jax.random.normal(kx2, (B, D2), dtype=jnp.float32)
    lg2 = 0.1 * jax.random.normal(kg2, (D2,), dtype=jnp.float32)
    bt2 = 0.1 * jax.random.normal(kb2, (D2,), dtype=jnp.float32)
    fwd_t = jax.jit(functools.partial(batch_norm_flow_direct, eps=1e-5, momentum=0.0,
                                      _force_feature_tiling=True))
    y3, logdet3, _, _, bm3, bv3 = fwd_t(x2, lg2, bt2)
    jax.block_until_ready(y3)
    y3r, ld3r, m3r, v3r = _reference_direct(x2, lg2, bt2, eps=1e-5)
    assert jnp.allclose(y3, y3r, atol=1e-5, rtol=1e-5)
    assert jnp.allclose(logdet3, ld3r, atol=1e-4, rtol=1e-4)
    assert jnp.allclose(bm3, m3r, atol=1e-5, rtol=1e-5)
    assert jnp.allclose(bv3, v3r, atol=1e-5, rtol=1e-5)

    # TODO(synk): 'inverse' mode and eval-mode (running-stat) branches reuse the same
    # elementwise structure but are not exercised here.

    print("KERNEL_OK")
</pallas_src>

<mosaic_0001>
module attributes {stable_mosaic.version = 11 : i64} {
  func.func @_bn_flow_direct_kernel(%arg0: memref<16x32xf32, #tpu.memory_space<vmem>>, %arg1: memref<2x32xf32, #tpu.memory_space<vmem>>, %arg2: memref<16x32xf32, #tpu.memory_space<vmem>>, %arg3: memref<3x32xf32, #tpu.memory_space<vmem>>) attributes {dimension_semantics = [], scalar_prefetch = 0 : i64, scratch_operands = 0 : i64, tpu.core_type = #tpu.core_type<tc>} {
    %c0 = arith.constant 0 : index
    %c0_0 = arith.constant 0 : index
    %0 = vector.load %arg0[%c0, %c0_0] : memref<16x32xf32, #tpu.memory_space<vmem>>, vector<16x32xf32>
    %c0_1 = arith.constant 0 : index
    %c0_2 = arith.constant 0 : index
    %1 = vector.load %arg1[%c0_1, %c0_2] : memref<2x32xf32, #tpu.memory_space<vmem>>, vector<1x32xf32>
    %c1 = arith.constant 1 : index
    %c0_3 = arith.constant 0 : index
    %2 = vector.load %arg1[%c1, %c0_3] : memref<2x32xf32, #tpu.memory_space<vmem>>, vector<1x32xf32>
    %cst = arith.constant dense<0.000000e+00> : vector<32xf32>
    %3 = vector.multi_reduction <add>, %0, %cst [0] : vector<16x32xf32> to vector<32xf32>
    %4 = vector.shape_cast %3 : vector<32xf32> to vector<1x32xf32>
    %cst_4 = arith.constant 6.250000e-02 : f32
    %5 = vector.broadcast %cst_4 : f32 to vector<1x32xf32>
    %6 = arith.mulf %4, %5 : vector<1x32xf32>
    %7 = vector.broadcast %6 : vector<1x32xf32> to vector<16x32xf32>
    %8 = arith.subf %0, %7 : vector<16x32xf32>
    %9 = arith.mulf %8, %8 : vector<16x32xf32>
    %cst_5 = arith.constant dense<0.000000e+00> : vector<32xf32>
    %10 = vector.multi_reduction <add>, %9, %cst_5 [0] : vector<16x32xf32> to vector<32xf32>
    %11 = vector.shape_cast %10 : vector<32xf32> to vector<1x32xf32>
    %cst_6 = arith.constant 6.250000e-02 : f32
    %12 = vector.broadcast %cst_6 : f32 to vector<1x32xf32>
    %13 = arith.mulf %11, %12 : vector<1x32xf32>
    %cst_7 = arith.constant 9.99999974E-6 : f32
    %14 = vector.broadcast %cst_7 : f32 to vector<1x32xf32>
    %15 = arith.addf %13, %14 : vector<1x32xf32>
    %16 = math.exp %1 : vector<1x32xf32>
    %17 = math.rsqrt %15 : vector<1x32xf32>
    %18 = arith.mulf %16, %17 : vector<1x32xf32>
    %19 = arith.mulf %6, %18 : vector<1x32xf32>
    %20 = arith.subf %2, %19 : vector<1x32xf32>
    %21 = vector.broadcast %18 : vector<1x32xf32> to vector<16x32xf32>
    %22 = arith.mulf %0, %21 : vector<16x32xf32>
    %23 = vector.broadcast %20 : vector<1x32xf32> to vector<16x32xf32>
    %24 = arith.addf %22, %23 : vector<16x32xf32>
    %c0_8 = arith.constant 0 : index
    %c0_9 = arith.constant 0 : index
    %25 = vector.load %arg2[%c0_8, %c0_9] : memref<16x32xf32, #tpu.memory_space<vmem>>, vector<16x32xf32>
    tpu.vector_store %arg2[%c0_8, %c0_9], %24 {strides = array<i32>} : memref<16x32xf32, #tpu.memory_space<vmem>>, vector<16x32xf32>,
    %26 = math.log %15 : vector<1x32xf32>
    %cst_10 = arith.constant 5.000000e-01 : f32
    %27 = vector.broadcast %cst_10 : f32 to vector<1x32xf32>
    %28 = arith.mulf %27, %26 : vector<1x32xf32>
    %29 = arith.subf %1, %28 : vector<1x32xf32>
    %30 = tpu.concatenate %6, %15, %29 in 0 : vector<1x32xf32>, vector<1x32xf32>, vector<1x32xf32> -> vector<3x32xf32>
    %c0_11 = arith.constant 0 : index
    %c0_12 = arith.constant 0 : index
    %31 = vector.load %arg3[%c0_11, %c0_12] : memref<3x32xf32, #tpu.memory_space<vmem>>, vector<3x32xf32>
    tpu.vector_store %arg3[%c0_11, %c0_12], %30 {strides = array<i32>} : memref<3x32xf32, #tpu.memory_space<vmem>>, vector<3x32xf32>,
    return
  }
}

</mosaic_0001>

<bundles_post_ra>
// kernel: batch_norm_flow_direct.1
= control target key start
LH: loop header
LB: loop body
LE: loop exit
PB: predicated region body
PF: predicated region fallthrough
CT: control target
= control target key end

     0   :  { %9 = vsyncpa [#allocation3], 0  ;;  %s239_s0 = inlined_call_operand.hbm [shape: f32[16,32], index: 0, kind: input, shape index: {}]   ;;  %s240_s1 = inlined_call_operand.vmem [shape: f32[2,32], index: 1, kind: input, shape index: {}]   ;;  %s241_s2 = inlined_call_operand.hbm [shape: f32[16,32], index: 2, kind: output, shape index: {0}]   ;;  %s242_s3 = inlined_call_operand.vmem [shape: f32[3,32], index: 3, kind: output, shape index: {1}]  }
   0x1   :  { %10 = vsyncpa [#allocation4], 0  ;;  %s170_s12 = smov [#allocation2]   ;;  %s122_s16 = scalar_lea.hbm %s239_s0, 256 }
   0x2   :  { %s16_s13 = sshll.u32 %s170_s12, 4  ;;  %p123_p0 = scmp.ne.s32.totalorder %s239_s0, %s122_s16  ;;  %s17_s13 = int_to_ptr.vmem [resolvable:$true] %s16_s13 }
   0x3   :  { %p126_p1 = scmp.lt.u32.totalorder %s122_s16, %s239_s0 }
   0x5   :  { %p128_p2 = pnand %p126_p1, %p123_p0 }
   0x7   :  { %131 = shalt.err (!%p128_p2)
}
   0x8   :  { %s132_s21 = scalar_lea.vmem %s17_s13, 256  ;;  %p137_p4 = scmp.lt.s32.totalorder %s17_s13, %s17_s13 }
   0x9   :  { %p133_p3 = scmp.ne.s32.totalorder %s17_s13, %s132_s21  ;;  %p138_p5 = scmp.lt.s32.totalorder %s132_s21, %s132_s21 }
   0xb   :  { %p139_p6 = por %p138_p5, %p137_p4 }
   0xd   :  { %p140_p7 = pnand %p139_p6, %p133_p3 }
   0xf   :  { %143 = shalt.err (!%p140_p7)
}
  0x10   :  { %s171_s22 = smov 128   ;;  %s172_s23 = smov 8  }
  0x11   :  { %22 = dma.hbm_to_vmem [thread:$0]  %s239_s0, 256, %s17_s13, [#allocation3], %s171_s22, %s171_s22, %s172_s23  }
  0x12   :  { %166 = dma.done.wait [#allocation3], 256  }
  0x13   :  { %167 = vsyncadd [#allocation3], 4294967040  ;;  %vm32_vm0 = vcmask 261120   ;;  %v28_v0 = vld [vmem:[#allocation2] sm:$0xff]  ;;  %v29_v1 = vld [vmem:[#allocation2 + $0x8] sm:$0xff]  ;;  %v64_v29 = vlaneseq  ;;  %vm85_vm1 = vcmask 1040384  }
  0x14   :  { %v33_v2 = vsel %vm32_vm0, %v28_v0, 0.0  ;;  %v34_v3 = vsel %vm32_vm0, %v29_v1, 0.0  ;;  %v30_v23 = vld [vmem:[%s240_s1] sm:$0x1]  ;;  %v31_v36 = vld [vmem:[%s240_s1 + $0x1] sm:$0x1] }
  0x15   :  { %v35_v4 = vadd.f32 %v34_v3, %v33_v2  ;;  %v58_v26 = vmul.f32 1.442695, %v30_v23  ;;  %v65_v30 = vshrl.u32 %v64_v29, 7  ;;  %s173_s29 = smov [#allocation5]   ;;  %vm87_vm2 = vcmask 1041408  }
  0x16   :  { %s96_s30 = sshll.u32 %s173_s29, 4  ;;  %vm89_vm3 = vcmask 256000   ;;  %s97_s30 = int_to_ptr.vmem [resolvable:$true] %s96_s30 }
  0x17   :  { %v36_v5 = vrot.slane %v35_v4, 4  ;;  %116 = vpow2.f32 %v58_v26  ;;  %v66_v32 = vsub.s32 0, %v65_v30  ;;  %s144_s5 = scalar_lea.vmem %s97_s30, 256  ;;  %p149_p9 = scmp.lt.s32.totalorder %s97_s30, %s97_s30 }
  0x18   :  { %p145_p8 = scmp.ne.s32.totalorder %s97_s30, %s144_s5  ;;  %p150_p10 = scmp.lt.s32.totalorder %s144_s5, %s144_s5 }
  0x19   :  { %v37_v6 = vadd.f32 %v36_v5, %v35_v4 }
  0x1a   :  { %p151_p11 = por %p150_p10, %p149_p9 }
  0x1b   :  { %v38_v7 = vrot.slane %v37_v6, 2 }
  0x1c   :  { %p152_p12 = pnand %p151_p11, %p145_p8 }
  0x1d   :  { %v39_v8 = vadd.f32 %v38_v7, %v37_v6 }
  0x1f   :  { %v40_v9 = vrot.slane %v39_v8, 1 }
  0x21   :  { %v41_v10 = vadd.f32 %v40_v9, %v39_v8  ;;  %v117_v31 = vpop.eup %116 }
  0x23   :  { %v42_v11 = vmul.f32 0.0625, %v41_v10 }
  0x25   :  { %v43_v12 = vsub.f32 %v28_v0, %v42_v11  ;;  %v44_v13 = vsub.f32 %v29_v1, %v42_v11 }
  0x27   :  { %v45_v14 = vmul.f32 %v43_v12, %v43_v12  ;;  %v46_v15 = vmul.f32 %v44_v13, %v44_v13 }
  0x29   :  { %v47_v16 = vsel %vm32_vm0, %v45_v14, 0.0  ;;  %v48_v17 = vsel %vm32_vm0, %v46_v15, 0.0 }
  0x2a   :  { %v49_v18 = vadd.f32 %v48_v17, %v47_v16 }
  0x2c   :  { %v50_v19 = vrot.slane %v49_v18, 4 }
  0x2e   :  { %v51_v20 = vadd.f32 %v50_v19, %v49_v18 }
  0x30   :  { %v52_v21 = vrot.slane %v51_v20, 2 }
  0x32   :  { %v53_v22 = vadd.f32 %v52_v21, %v51_v20 }
  0x34   :  { %v54_v24 = vrot.slane %v53_v22, 1 }
  0x36   :  { %v55_v25 = vadd.f32 %v54_v24, %v53_v22 }
  0x38   :  { %v56_v27 = vmul.f32 0.0625, %v55_v25 }
  0x3a   :  { %v57_v28 = vadd.f32 1e-05, %v56_v27 }
  0x3c   :  { %118 = vrsqrt.f32 %v57_v28  ;;  %v86_v46 = vsel %vm85_vm1, %v42_v11, %v57_v28 }
  0x3d   :  { %120 = vlog2.f32 %v57_v28 }
  0x46   :  { %v119_v33 = vpop.eup %118 }
  0x47   :  { %v121_v34 = vpop.eup %120  ;;  %v61_v35 = vmul.f32 %v119_v33, %v117_v31 }
  0x48   :  { %v79_v37 = vmul.f32 0.6931472, %v121_v34 }
  0x49   :  { %v62_v38 = vmul.f32 %v61_v35, %v42_v11  ;;  %v67_v39 = vrot.slane %v61_v35, %v66_v32 }
  0x4a   :  { %v80_v40 = vmul.f32 0.5, %v79_v37 }
  0x4b   :  { %v63_v41 = vsub.f32 %v31_v36, %v62_v38  ;;  %v68_v42 = vmul.f32 %v67_v39, %v28_v0  ;;  %v69_v43 = vmul.f32 %v67_v39, %v29_v1 }
  0x4c   :  { %v81_v44 = vsub.f32 %v30_v23, %v80_v40 }
  0x4d   :  { %v73_v45 = vrot.slane %v63_v41, %v66_v32 }
  0x4e   :  { %v83_v47 = vrot.slane %v81_v44, 6 }
  0x4f   :  { %v74_v48 = vadd.f32 %v73_v45, %v68_v42  ;;  %v75_v49 = vadd.f32 %v73_v45, %v69_v43 }
  0x50   :  { %v88_v50 = vsel %vm87_vm2, %v86_v46, %v83_v47 }
  0x51   :  { %76 = vst.msk [vmem:[#allocation5] sm:$0xff] %vm32_vm0, %v74_v48  ;;  %77 = vst.msk [vmem:[#allocation5 + $0x8] sm:$0xff] %vm32_vm0, %v75_v49 }
  0x52   :  { %90 = vst.msk [vmem:[%s242_s3] sm:$0x7] %vm89_vm3, %v88_v50 }
  0x53   :  { %155 = shalt.err (!%p152_p12)
}
  0x54   :  { %s156_s8 = scalar_lea.hbm %s241_s2, 256 }
  0x55   :  { %p157_p13 = scmp.ne.s32.totalorder %s241_s2, %s156_s8  ;;  %p160_p0 = scmp.lt.u32.totalorder %s156_s8, %s241_s2 }
  0x57   :  { %p162_p1 = pnand %p160_p0, %p157_p13 }
  0x59   :  { %165 = shalt.err (!%p162_p1)
}
  0x5a   :  { %102 = dma.vmem_to_hbm [thread:$0]  %s97_s30, 256, %s241_s2, [#allocation4], %s171_s22, %s171_s22, %s172_s23  }
  0x5b   :  { %168 = dma.done.wait [#allocation4], 256  }
  0x5c   :  { %169 = vsyncadd [#allocation4], 4294967040 }
  0x5d   :  { %110 = vsyncpa [#allocation3], 1 }
  0x5e   :  { %111 = vsyncpa [#allocation4], 1 }

</bundles_post_ra>
